<compile_context>
chip_gen: v7x
topology: tpu7x:2x2x1
jax: 0.10.0
libtpu: 0.0.40
codegen_flags: <defaults>
</compile_context>

<pallas_src>
import jax
import jax.numpy as jnp
from jax.experimental import pallas as pl
from jax.experimental.pallas import tpu as pltpu

NEG_INF = -1e30


def knowledge_attention_kernel(m_ref, g_ref, lens_ref, w_ref, b_ref, o_ref):
    # Block shapes (BB batch elements per grid step, padded L/Hp):
    #   m_ref: (BB, L, Hp)   g_ref: (BB, 1, Hp)   lens_ref: (BB, 1, 1) int32
    #   w_ref: (4, 1, Hp)    b_ref: (1, 1)        o_ref: (BB, L, Hp)
    m = m_ref[...].astype(jnp.float32)            # (BB, L, Hp)
    g = g_ref[...].astype(jnp.float32)            # (BB, 1, Hp)
    bb, L, Hp = m.shape

    # knowledge_att = m @ g^T  -> (BB, L, 1)   (lane reduce over channels)
    logits = jnp.sum(m * g, axis=-1, keepdims=True)

    # Padding mask regenerated in-kernel from per-batch valid lengths.
    pos = jax.lax.broadcasted_iota(jnp.int32, (bb, L, 1), 1)
    valid = pos < lens_ref[...]                   # (BB, L, 1) bool
    masked = jnp.where(valid, logits, NEG_INF)

    # masked softmax along c_len (dim=-2), fused with the weighted sum:
    # mg = relu(m^T att) = relu(sum_l e_l * m_l) / sum_l e_l
    mmax = jnp.max(masked, axis=1, keepdims=True)            # (BB, 1, 1)
    e = jnp.exp(masked - mmax)                               # (BB, L, 1)
    denom = jnp.sum(e, axis=1, keepdims=True)                # (BB, 1, 1)
    num = jnp.sum(e * m, axis=1, keepdims=True)              # (BB, 1, Hp)
    mg = jnp.maximum(num * (1.0 / denom), 0.0)               # (BB, 1, Hp)

    # Folded gate projection: sigmoid(Conv1d_4H->1([m, Mg, m*Mg, m-Mg]))
    #   = sigmoid( sum_h m_h * (w1 + w4 + Mg*w3)_h + (Mg · (w2 - w4) + b) )
    w = w_ref[...]                                           # (4, 1, Hp)
    w1, w2, w3, w4 = w[0], w[1], w[2], w[3]                  # each (1, Hp)
    w_eff = w1 + w4 + mg * w3                                # (BB, 1, Hp)
    const = jnp.sum(mg * (w2 - w4), axis=-1, keepdims=True) + b_ref[...]  # (BB,1,1)
    gate_logit = jnp.sum(m * w_eff, axis=-1, keepdims=True) + const       # (BB,L,1)
    gate = jax.nn.sigmoid(gate_logit)

    # out = gate*m + (1-gate)*Mg  ==  mg + gate*(m - mg)  (implicit broadcast)
    out = mg + gate * (m - mg)                               # (BB, L, Hp)
    o_ref[...] = out.astype(o_ref.dtype)


def _round_up(x, n):
    return ((x + n - 1) // n) * n


def _pick_batch_block(B, bytes_per_batch, target_bytes=1 << 20):
    """Largest divisor of B whose block stays <= target bytes; prefer keeping
    >= 2 grid steps so megacore (v7x, 2 TCs) has work on both cores."""
    divisors = [d for d in range(1, B + 1) if B % d == 0]
    fitting = [d for d in divisors if d * bytes_per_batch <= target_bytes] or [1]
    multi_step = [d for d in fitting if B // d >= 2]
    return max(multi_step) if multi_step else max(fitting)


def knowledge_attention(m, g, mask, w, b):
    """m: (B, L, H), g: (B, H), mask: (B, L) 0/1 prefix padding mask,
    w: (4H,) Conv1d(4H->1, k=1) weight, b: (1,) bias."""
    B, L, H = m.shape
    Hp = _round_up(max(H, 128), 128)   # lane-dense channel axis
    Lp = _round_up(L, 8)               # sublane-aligned c_len axis

    m_p = jnp.pad(m, ((0, 0), (0, Lp - L), (0, Hp - H)))
    g_p = jnp.pad(g.astype(jnp.float32), ((0, 0), (0, Hp - H))).reshape(B, 1, Hp)
    w_p = jnp.pad(w.astype(jnp.float32).reshape(4, H),
                  ((0, 0), (0, Hp - H))).reshape(4, 1, Hp)
    b_p = jnp.asarray(b, jnp.float32).reshape(1, 1)
    # Padding mask -> per-batch valid length; mask is rebuilt in-kernel (iota).
    lens = jnp.sum(mask.astype(jnp.int32), axis=-1).reshape(B, 1, 1)

    bb = _pick_batch_block(B, Lp * Hp * m_p.dtype.itemsize)
    grid = (B // bb,)

    out_p = pl.pallas_call(
        knowledge_attention_kernel,
        out_shape=jax.ShapeDtypeStruct((B, Lp, Hp), m.dtype),
        grid=grid,
        in_specs=[
            pl.BlockSpec((bb, Lp, Hp), lambda i: (i, 0, 0)),   # m
            pl.BlockSpec((bb, 1, Hp), lambda i: (i, 0, 0)),    # g
            pl.BlockSpec((bb, 1, 1), lambda i: (i, 0, 0)),     # valid lengths
            pl.BlockSpec((4, 1, Hp), lambda i: (0, 0, 0)),     # gate weight
            pl.BlockSpec((1, 1), lambda i: (0, 0)),            # gate bias
        ],
        out_specs=pl.BlockSpec((bb, Lp, Hp), lambda i: (i, 0, 0)),
        compiler_params=pltpu.CompilerParams(
            dimension_semantics=("parallel",)),
    )(m_p, g_p, lens, w_p, b_p)

    return out_p[:, :L, :H]


def reference(m, g, mask, w, b):
    """Pure-JAX reference of the PyTorch forward (unfolded)."""
    B, L, H = m.shape
    logits = jnp.einsum("blh,bh->bl", m, g)[..., None]          # (B, L, 1)
    maskf = mask.reshape(B, -1, 1).astype(jnp.float32)
    masked = maskf * logits + (1.0 - maskf) * NEG_INF
    att = jax.nn.softmax(masked, axis=-2)                       # (B, L, 1)
    mg = jax.nn.relu(jnp.einsum("blh,bl->bh", m, att[..., 0]))  # (B, H)
    Mg = jnp.broadcast_to(mg[:, None, :], m.shape)              # (B, L, H)
    feat = jnp.concatenate([m, Mg, m * Mg, m - Mg], axis=-1)    # (B, L, 4H)
    gate = jax.nn.sigmoid(feat @ w.reshape(-1, 1) + b)          # (B, L, 1)
    return gate * m + (1.0 - gate) * Mg


if __name__ == "__main__":
    B, L, H = 2, 8, 32  # batch, c_len, hidden_size (hidden_size % 2 == 0)

    key = jax.random.PRNGKey(0)
    k_m, k_g, k_w, k_b = jax.random.split(key, 4)

    m = jax.random.normal(k_m, (B, L, H), dtype=jnp.float32)
    g = jax.random.normal(k_g, (B, H), dtype=jnp.float32)
    # mask: valid prefix per batch element (at least one valid position)
    lens_demo = jnp.array([6, 8], dtype=jnp.int32)
    mask = (jnp.arange(L)[None, :] < lens_demo[:, None]).astype(jnp.float32)

    # gate_proj parameters: Conv1d(4H, 1, k=1) -> weight (4H,), bias (1,)
    w = jax.random.normal(k_w, (4 * H,), dtype=jnp.float32) * 0.05
    b = jax.random.normal(k_b, (1,), dtype=jnp.float32) * 0.05

    out = knowledge_attention(m, g, mask, w, b)
    out = jax.block_until_ready(out)

    ref = reference(m, g, mask, w, b)
    assert out.shape == (B, L, H)
    assert jnp.allclose(out, ref, rtol=1e-5, atol=1e-5), "mismatch vs reference"

    print("KERNEL_OK")
</pallas_src>

<mosaic_0001>
module attributes {stable_mosaic.version = 11 : i64} {
  func.func @knowledge_attention_kernel(%arg0: i32, %arg1: memref<1x8x128xf32, #tpu.memory_space<vmem>>, %arg2: memref<1x1x128xf32, #tpu.memory_space<vmem>>, %arg3: memref<1x1x1xi32, #tpu.memory_space<vmem>>, %arg4: memref<4x1x128xf32, #tpu.memory_space<vmem>>, %arg5: memref<1x1xf32, #tpu.memory_space<vmem>>, %arg6: memref<1x8x128xf32, #tpu.memory_space<vmem>>) attributes {dimension_semantics = [#tpu.dimension_semantics<parallel>], iteration_bounds = array<i64: 2>, scalar_prefetch = 0 : i64, scratch_operands = 0 : i64, tpu.core_type = #tpu.core_type<tc>, window_params = [{transform_indices = @transform_0, window_bounds = array<i64: 1, 8, 128>}, {transform_indices = @transform_1, window_bounds = array<i64: 1, 1, 128>}, {transform_indices = @transform_2, window_bounds = array<i64: 1, 1, 1>}, {pipeline_mode = #tpu.pipeline_mode<synchronous>, transform_indices = @transform_3, window_bounds = array<i64: 4, 1, 128>}, {pipeline_mode = #tpu.pipeline_mode<synchronous>, transform_indices = @transform_4, window_bounds = array<i64: 1, 1>}, {transform_indices = @transform_5, window_bounds = array<i64: 1, 8, 128>}]} {
    %c0 = arith.constant 0 : index
    %c0_0 = arith.constant 0 : index
    %c0_1 = arith.constant 0 : index
    %0 = vector.load %arg1[%c0, %c0_0, %c0_1] : memref<1x8x128xf32, #tpu.memory_space<vmem>>, vector<1x8x128xf32>
    %c0_2 = arith.constant 0 : index
    %c0_3 = arith.constant 0 : index
    %c0_4 = arith.constant 0 : index
    %1 = vector.load %arg2[%c0_2, %c0_3, %c0_4] : memref<1x1x128xf32, #tpu.memory_space<vmem>>, vector<1x1x128xf32>
    %2 = vector.broadcast %1 : vector<1x1x128xf32> to vector<1x8x128xf32>
    %3 = arith.mulf %0, %2 : vector<1x8x128xf32>
    %cst = arith.constant dense<0.000000e+00> : vector<1x8xf32>
    %4 = vector.multi_reduction <add>, %3, %cst [2] : vector<1x8x128xf32> to vector<1x8xf32>
    %5 = vector.shape_cast %4 : vector<1x8xf32> to vector<1x8x1xf32>
    %6 = tpu.iota {dimensions = array<i32: 1>} : vector<1x8x1xi32>
    %c0_5 = arith.constant 0 : index
    %c0_6 = arith.constant 0 : index
    %c0_7 = arith.constant 0 : index
    %7 = vector.load %arg3[%c0_5, %c0_6, %c0_7] : memref<1x1x1xi32, #tpu.memory_space<vmem>>, vector<1x1x1xi32>
    %8 = vector.broadcast %7 : vector<1x1x1xi32> to vector<1x8x1xi32>
    %9 = arith.cmpi slt, %6, %8 : vector<1x8x1xi32>
    %cst_8 = arith.constant -1.000000e+30 : f32
    %10 = vector.broadcast %cst_8 : f32 to vector<1x8x1xf32>
    %11 = arith.select %9, %5, %10 : vector<1x8x1xi1>, vector<1x8x1xf32>
    %cst_9 = arith.constant dense<0xFF800000> : vector<1x1xf32>
    %12 = vector.multi_reduction <maximumf>, %11, %cst_9 [1] : vector<1x8x1xf32> to vector<1x1xf32>
    %13 = vector.shape_cast %12 : vector<1x1xf32> to vector<1x1x1xf32>
    %14 = vector.broadcast %13 : vector<1x1x1xf32> to vector<1x8x1xf32>
    %15 = arith.subf %11, %14 : vector<1x8x1xf32>
    %16 = math.exp %15 : vector<1x8x1xf32>
    %cst_10 = arith.constant dense<0.000000e+00> : vector<1x1xf32>
    %17 = vector.multi_reduction <add>, %16, %cst_10 [1] : vector<1x8x1xf32> to vector<1x1xf32>
    %18 = vector.shape_cast %17 : vector<1x1xf32> to vector<1x1x1xf32>
    %19 = vector.broadcast %16 : vector<1x8x1xf32> to vector<1x8x128xf32>
    %20 = arith.mulf %19, %0 : vector<1x8x128xf32>
    %cst_11 = arith.constant dense<0.000000e+00> : vector<1x128xf32>
    %21 = vector.multi_reduction <add>, %20, %cst_11 [1] : vector<1x8x128xf32> to vector<1x128xf32>
    %22 = vector.shape_cast %21 : vector<1x128xf32> to vector<1x1x128xf32>
    %cst_12 = arith.constant 1.000000e+00 : f32
    %23 = vector.broadcast %cst_12 : f32 to vector<1x1x1xf32>
    %24 = arith.divf %23, %18 : vector<1x1x1xf32>
    %25 = vector.broadcast %24 : vector<1x1x1xf32> to vector<1x1x128xf32>
    %26 = arith.mulf %22, %25 : vector<1x1x128xf32>
    %cst_13 = arith.constant 0.000000e+00 : f32
    %27 = vector.broadcast %cst_13 : f32 to vector<1x1x128xf32>
    %28 = arith.maximumf %26, %27 : vector<1x1x128xf32>
    %c0_14 = arith.constant 0 : index
    %c0_15 = arith.constant 0 : index
    %c0_16 = arith.constant 0 : index
    %29 = vector.load %arg4[%c0_14, %c0_15, %c0_16] : memref<4x1x128xf32, #tpu.memory_space<vmem>>, vector<4x1x128xf32>
    %30 = vector.extract_strided_slice %29 {offsets = [0, 0, 0], sizes = [1, 1, 128], strides = [1, 1, 1]} : vector<4x1x128xf32> to vector<1x1x128xf32>
    %31 = vector.shape_cast %30 : vector<1x1x128xf32> to vector<1x128xf32>
    %32 = vector.extract_strided_slice %29 {offsets = [1, 0, 0], sizes = [1, 1, 128], strides = [1, 1, 1]} : vector<4x1x128xf32> to vector<1x1x128xf32>
    %33 = vector.shape_cast %32 : vector<1x1x128xf32> to vector<1x128xf32>
    %34 = vector.extract_strided_slice %29 {offsets = [2, 0, 0], sizes = [1, 1, 128], strides = [1, 1, 1]} : vector<4x1x128xf32> to vector<1x1x128xf32>
    %35 = vector.shape_cast %34 : vector<1x1x128xf32> to vector<1x128xf32>
    %36 = vector.extract_strided_slice %29 {offsets = [3, 0, 0], sizes = [1, 1, 128], strides = [1, 1, 1]} : vector<4x1x128xf32> to vector<1x1x128xf32>
    %37 = vector.shape_cast %36 : vector<1x1x128xf32> to vector<1x128xf32>
    %38 = arith.addf %31, %37 : vector<1x128xf32>
    %39 = vector.shape_cast %35 : vector<1x128xf32> to vector<1x1x128xf32>
    %40 = arith.mulf %28, %39 : vector<1x1x128xf32>
    %41 = vector.shape_cast %38 : vector<1x128xf32> to vector<1x1x128xf32>
    %42 = arith.addf %41, %40 : vector<1x1x128xf32>
    %43 = arith.subf %33, %37 : vector<1x128xf32>
    %44 = vector.shape_cast %43 : vector<1x128xf32> to vector<1x1x128xf32>
    %45 = arith.mulf %28, %44 : vector<1x1x128xf32>
    %cst_17 = arith.constant dense<0.000000e+00> : vector<1x1xf32>
    %46 = vector.multi_reduction <add>, %45, %cst_17 [2] : vector<1x1x128xf32> to vector<1x1xf32>
    %47 = vector.shape_cast %46 : vector<1x1xf32> to vector<1x1x1xf32>
    %c0_18 = arith.constant 0 : index
    %c0_19 = arith.constant 0 : index
    %48 = vector.load %arg5[%c0_18, %c0_19] : memref<1x1xf32, #tpu.memory_space<vmem>>, vector<1x1xf32>
    %49 = vector.shape_cast %48 : vector<1x1xf32> to vector<1x1x1xf32>
    %50 = arith.addf %47, %49 : vector<1x1x1xf32>
    %51 = vector.broadcast %42 : vector<1x1x128xf32> to vector<1x8x128xf32>
    %52 = arith.mulf %0, %51 : vector<1x8x128xf32>
    %cst_20 = arith.constant dense<0.000000e+00> : vector<1x8xf32>
    %53 = vector.multi_reduction <add>, %52, %cst_20 [2] : vector<1x8x128xf32> to vector<1x8xf32>
    %54 = vector.shape_cast %53 : vector<1x8xf32> to vector<1x8x1xf32>
    %55 = vector.broadcast %50 : vector<1x1x1xf32> to vector<1x8x1xf32>
    %56 = arith.addf %54, %55 : vector<1x8x1xf32>
    %57 = arith.negf %56 : vector<1x8x1xf32>
    %58 = math.exp %57 : vector<1x8x1xf32>
    %cst_21 = arith.constant 1.000000e+00 : f32
    %59 = vector.broadcast %cst_21 : f32 to vector<1x8x1xf32>
    %60 = arith.addf %59, %58 : vector<1x8x1xf32>
    %61 = arith.divf %59, %60 : vector<1x8x1xf32>
    %62 = vector.broadcast %28 : vector<1x1x128xf32> to vector<1x8x128xf32>
    %63 = arith.subf %0, %62 : vector<1x8x128xf32>
    %64 = vector.broadcast %61 : vector<1x8x1xf32> to vector<1x8x128xf32>
    %65 = arith.mulf %64, %63 : vector<1x8x128xf32>
    %66 = vector.broadcast %28 : vector<1x1x128xf32> to vector<1x8x128xf32>
    %67 = arith.addf %66, %65 : vector<1x8x128xf32>
    %c0_22 = arith.constant 0 : index
    %c0_23 = arith.constant 0 : index
    %c0_24 = arith.constant 0 : index
    %68 = vector.load %arg6[%c0_22, %c0_23, %c0_24] : memref<1x8x128xf32, #tpu.memory_space<vmem>>, vector<1x8x128xf32>
    tpu.vector_store %arg6[%c0_22, %c0_23, %c0_24], %67 {strides = array<i32>} : memref<1x8x128xf32, #tpu.memory_space<vmem>>, vector<1x8x128xf32>,
    return
  }
  func.func @transform_0(%arg0: i32) -> (i32, i32, i32) {
    %c0_i32 = arith.constant 0 : i32
    %c0_i32_0 = arith.constant 0 : i32
    %c0_i32_1 = arith.constant 0 : i32
    return %arg0, %c0_i32, %c0_i32_0 : i32, i32, i32
  }
  func.func @transform_1(%arg0: i32) -> (i32, i32, i32) {
    %c0_i32 = arith.constant 0 : i32
    %c0_i32_0 = arith.constant 0 : i32
    %c0_i32_1 = arith.constant 0 : i32
    return %arg0, %c0_i32, %c0_i32_0 : i32, i32, i32
  }
  func.func @transform_2(%arg0: i32) -> (i32, i32, i32) {
    %c0_i32 = arith.constant 0 : i32
    %c0_i32_0 = arith.constant 0 : i32
    %c0_i32_1 = arith.constant 0 : i32
    return %arg0, %c0_i32, %c0_i32_0 : i32, i32, i32
  }
  func.func @transform_3(%arg0: i32) -> (i32, i32, i32) {
    %c0_i32 = arith.constant 0 : i32
    %c0_i32_0 = arith.constant 0 : i32
    %c0_i32_1 = arith.constant 0 : i32
    %c0_i32_2 = arith.constant 0 : i32
    return %c0_i32, %c0_i32_0, %c0_i32_1 : i32, i32, i32
  }
  func.func @transform_4(%arg0: i32) -> (i32, i32) {
    %c0_i32 = arith.constant 0 : i32
    %c0_i32_0 = arith.constant 0 : i32
    %c0_i32_1 = arith.constant 0 : i32
    return %c0_i32, %c0_i32_0 : i32, i32
  }
  func.func @transform_5(%arg0: i32) -> (i32, i32, i32) {
    %c0_i32 = arith.constant 0 : i32
    %c0_i32_0 = arith.constant 0 : i32
    %c0_i32_1 = arith.constant 0 : i32
    return %arg0, %c0_i32, %c0_i32_0 : i32, i32, i32
  }
}

</mosaic_0001>

<bundles_post_ra>
// kernel: tpu_custom_call.1
= control target key start
LH: loop header
LB: loop body
LE: loop exit
PB: predicated region body
PF: predicated region fallthrough
CT: control target
= control target key end

     0   :  { %s872_s0 = inlined_call_operand.hbm [shape: f32[2,8,128], index: 0, kind: input, shape index: {}]   ;;  %s873_s1 = inlined_call_operand.vmem [shape: f32[2,1,128], index: 1, kind: input, shape index: {}]   ;;  %s874_s2 = inlined_call_operand.vmem [shape: s32[2,1,1], index: 2, kind: input, shape index: {}]   ;;  %s875_s3 = inlined_call_operand.vmem [shape: f32[4,1,128], index: 3, kind: input, shape index: {}]   ;;  %s876_s4 = inlined_call_operand.<no memory space> [shape: f32[1,1], index: 4, kind: input, shape index: {}]   ;;  %s877_s5 = inlined_call_operand.hbm [shape: f32[2,8,128], index: 5, kind: output, shape index: {}]  }
   0x1   :  { %v10_v0 = vstv %s876_s4 }
   0x2   :  { %11 = vst [vmem:[#allocation2] sm:$0x1] %v10_v0 }
   0x3   :  { %12 = vsyncpa [#allocation4], 0 }
   0x4   :  { %14 = vsyncpa [#allocation4 + $0x1], 0 }
   0x5   :  { %15 = vsyncpa [#allocation5], 0 }
   0x6   :  { %17 = vsyncpa [#allocation5 + $0x1], 0  ;;  %s681_s20 = smov 0   ;;  %s683_s21 = smov 0  }
   0x7   :  { %s685_s22 = smov 0   ;;  %s687_s23 = smov 0  }
   0x8 LB: > { %s702_s4 = sadd.s32 4294967295, %s643_s23   ;;  %s475_s24 = sadd.s32 4294967294, %s643_s23   ;;  %s643_s23 = sphi %s687_s23, %s892_s23   ;;  %s639_s22 = sphi %s685_s22, %s891_s22   ;;  %s635_s21 = sphi %s683_s21, %s890_s21   ;;  %s631_s20 = sphi %s681_s20, %s889_s20  }
   0x9   : > { %s706_s25 = sadd.s32 1, %s643_s23   ;;  %s30_s26 = sadd.s32 1, %s639_s22 }
   0xa   : > { %s27_s27 = ssub.s32 %s643_s23, %s706_s25  ;;  %p37_p0 = scmp.ne.s32.totalorder %s639_s22, %s635_s21 }
   0xb   : > { %p28_p1 = scmp.eq.s32.totalorder %s27_s27, 0  ;;  %p38_p2 = scmp.eq.s32.totalorder %s643_s23, 0 }
   0xc   : > { %p43_p3 = scmp.ne.s32.totalorder %s635_s21, %s631_s20  ;;  %p44_p4 = scmp.eq.s32.totalorder %s702_s4, 0 }
   0xd   : > { %s718_s28 = scalar_select %p28_p1, %s639_s22, %s30_s26  }
   0xe   : > { %p720_p5 = por %p38_p2, %p37_p0  ;;  %p724_p6 = por %p44_p4, %p43_p3 }
   0xf   : > { %p161_p7 = scmp.eq.s32.totalorder %s702_s4, 1  ;;  %p167_p8 = scmp.eq.s32.totalorder %s475_s24, 1 }
  0x10   : > { %p502_p10 = scmp.lt.s32.totalorder %s643_s23, 2  ;;  %s193_s8 = sand.u32 1, %s639_s22  }
  0x11   : > { %p731_p11 = por %p161_p7, %p37_p0  ;;  %p735_p12 = por %p167_p8, %p43_p3 }
  0x12   : > { %s479_s9 = sshll.u32 %s643_s23, 7  ;;  %s478_s10 = sshll.u32 %s193_s8, 3 }
  0x13   : > { %s881_s6 = scalar_select %p731_p11, 1, 0 }
  0x14   : > { %s882_s7 = scalar_select %p735_p12, 1, 0 }
  0x15   : > { %s744_s13 = scalar_lea.hbm %s872_s0, %s479_s9  ;;  %s197_s14 = scalar_lea.vmem [#allocation3], %s478_s10 }
  0x16   : > { %s204_s15 = sshll.u32 %s197_s14, 4  ;;  %p748_p13 = pnand %p502_p10, %p720_p5  ;;  %s752_s15 = int_to_ptr.vmem [resolvable:$true] %s204_s15 }
  0x17   : > { %s194_s17 = scalar_lea.sflag [#allocation4], %s193_s8  ;;  %s547_s18 = scalar_lea.hbm %s744_s13, 128 }
  0x18   : > { %p548_p2 = scmp.ne.s32.totalorder %s744_s13, %s547_s18  ;;  %p549_p3 = pneg %p748_p13 }
  0x19   : > { %s552_s26 = scalar_lea.hbm %s872_s0, 256  ;;  %p553_p5 = scmp.lt.u32.totalorder %s744_s13, %s872_s0 }
  0x1a   : > { %p550_p4 = pnand %p549_p3, %p548_p2  ;;  %p554_p8 = scmp.lt.u32.totalorder %s552_s26, %s547_s18 }
  0x1b   : > { %p556_p9 = scmp.lt.u32.totalorder %s547_s18, %s744_s13 }
  0x1c   : > { %p551_p7 = pneg %p550_p4  ;;  %p555_p10 = por %p554_p8, %p553_p5 }
  0x1e   : > { %p557_p0 = por %p556_p9, %p555_p10 }
  0x20   : > { %p558_p1 = pnand %p557_p0, %p551_p7 }
  0x22   : > { %561 = shalt.err (!%p558_p1)
}
  0x23   : > { %s562_s8 = scalar_lea.vmem %s752_s15, 128  ;;  %s645_s9 = smov [#allocation3]  }
  0x24   : > { %p563_p2 = scmp.ne.s32.totalorder %s752_s15, %s562_s8  ;;  %s567_s10 = sshll.u32 %s645_s9, 4  ;;  %s568_s10 = int_to_ptr.vmem [resolvable:$false] %s567_s10 }
  0x25   : > { %s569_s11 = scalar_lea.vmem %s568_s10, 256  ;;  %p570_p11 = scmp.lt.s32.totalorder %s752_s15, %s568_s10 }
  0x26   : > { %p565_p4 = pnand %p563_p2, %p549_p3  ;;  %p571_p5 = scmp.lt.s32.totalorder %s569_s11, %s562_s8 }
  0x28   : > { %p566_p12 = pneg %p565_p4  ;;  %p572_p8 = por %p571_p5, %p570_p11 }
  0x2a   : > { %p573_p9 = pnand %p572_p8, %p566_p12 }
  0x2c   : > { %576 = shalt.err (!%p573_p9)
}
  0x2d   : > { %497 = dma.hbm_to_vmem [thread:$0]  (!%p748_p13), %s744_s13, 128, %s752_s15, %s194_s17  }
  0x2e   : > { %p884_p0 = scmp.lt.s32.totalorder %s643_s23, 3  ;;  %p885_p1 = scmp.ge.s32.totalorder %s643_s23, 1 }
  0x30   : > { %p222_p3 = pnand %p885_p1, %p884_p0 }
  0x31   : > { %s786_s12 = sand.u32 (!%p222_p3), 1, %s635_s21  }
  0x32   : > { %225 = sbr.rel (%p222_p3) target bundleno = 717 (0x2cd), region = 40  ;;  %s481_s14 = sshll.u32 (!%p222_p3), %s786_s12, 3 }
  0x33   : > { %s228_s18 = scalar_lea.sflag (!%p222_p3), [#allocation4], %s786_s12  ;;  %s231_s16 = scalar_lea.vmem (!%p222_p3), [#allocation3], %s481_s14 }
  0x39   : > { %622 = dma.done.wait (%p724_p6), %s228_s18, 128  }
  0x3a   : > { %624 = vsyncadd (%p724_p6), %s228_s18, 4294967168  ;;  %p264_p11 = scmp.lt.s32.totalorder %s702_s4, 1  ;;  %v801_v1 = vld [vmem:[%s231_s16] sm:$0xff]  ;;  %v646_v4 = vmov 0   ;;  %v281_v5 = vlaneseq  ;;  %vm290_vm1 = vcmask 7168   ;;  %vm338_vm2 = vcmask 1040384  }
  0x3b   : > { %537 = vset.pattern.permute.xlu0 %v646_v4  ;;  %538 = vset.pattern.permute.xlu1 %v646_v4  ;;  %v330_v35 = vld [vmem:[%s875_s3 + $0x1] sm:$0x1]  ;;  %v332_v36 = vld [vmem:[%s875_s3 + $0x3] sm:$0x1]  ;;  %v329_v39 = vld [vmem:[%s875_s3] sm:$0x1] }
  0x3c   : > { %s265_s13 = scalar_select %p264_p11, %s702_s4, 1  ;;  %v282_v6 = vshrl.u32 %v281_v5, 7  ;;  %v336_v41 = vsub.f32 %v330_v35, %v332_v36  ;;  %v331_v42 = vld [vmem:[%s875_s3 + $0x2] sm:$0x1]  ;;  %v333_v44 = vadd.f32 %v332_v36, %v329_v39  ;;  %v342_v52 = vld [vmem:[#allocation2] sm:$0x1] }
  0x3d   : > { %s263_s15 = scalar_lea.vmem [#allocation6], %s481_s14  ;;  %p886_p12 = scmp.ne.s32.totalorder %s881_s6, 0 }
  0x3e   : > { %s266_s19 = scalar_lea.vmem %s873_s1, %s265_s13  ;;  %s269_s26 = scalar_lea.vmem %s874_s2, %s265_s13  ;;  %v347_v47 = vsub.s32 0, %v282_v6 }
  0x3f   : > { %v483_v2 = vld [vmem:[%s266_s19] ss:$0 sm:$0xff]  ;;  %s487_s13 = sshll.u32 %s702_s4, 7  ;;  %s387_s17 = sshll.u32 %s263_s15, 4  ;;  %s830_s17 = int_to_ptr.vmem [resolvable:$true] %s387_s17 }
  0x40   : > { %v278_v3 = vmul.f32 %v483_v2, %v801_v1  ;;  %v484_v7 = vld [vmem:[%s269_s26] ss:$0 sm:$0xff]  ;;  %s828_s24 = scalar_lea.hbm %s877_s5, %s487_s13  ;;  %s374_s26 = scalar_lea.sflag [#allocation5], %s786_s12 }
  0x41   : > { %vm288_vm0 = vcmp.lt.s32.totalorder %v282_v6, %v484_v7  ;;  %s577_s27 = scalar_lea.vmem %s830_s17, 128  ;;  %s647_s4 = smov [#allocation6]  }
  0x42   : > { %279 = vadd.xlane.f32.xlu0 %v278_v3  ;;  %p578_p6 = scmp.ne.s32.totalorder %s830_s17, %s577_s27  ;;  %s581_s14 = sshll.u32 %s647_s4, 4  ;;  %s582_s14 = int_to_ptr.vmem [resolvable:$false] %s581_s14 }
  0x43   : > { %s583_s29 = scalar_lea.vmem %s582_s14, 256  ;;  %p584_p10 = scmp.lt.s32.totalorder %s830_s17, %s582_s14 }
  0x44   : > { %p579_p13 = pnand %p578_p6, %p886_p12  ;;  %p585_p2 = scmp.lt.s32.totalorder %s583_s29, %s577_s27 }
  0x46   : > { %p580_p7 = pneg %p579_p13  ;;  %p586_p4 = por %p585_p2, %p584_p10 }
  0x48   : > { %p587_p5 = pnand %p586_p4, %p580_p7 }
  0xcf   : > { %v280_v8 = vpop.xlane.xlu0 %279 }
  0xd0   : > { %v289_v9 = vsel %vm288_vm0, %v280_v8, -1e+30 }
  0xd1   : > { %v291_v10 = vsel %vm290_vm1, %v289_v9, -inf }
  0xd2   : > { %v292_v11 = vrot.slane %v291_v10, 4 }
  0xd4   : > { %v293_v12 = vmax.f32 %v291_v10, %v292_v11 }
  0xd6   : > { %v294_v13 = vrot.slane %v293_v12, 2 }
  0xd8   : > { %v295_v14 = vmax.f32 %v293_v12, %v294_v13 }
  0xda   : > { %v296_v15 = vrot.slane %v295_v14, 1 }
  0xdc   : > { %v297_v16 = vmax.f32 %v295_v14, %v296_v15 }
  0xde   : > { %v298_v17 = vsub.f32 %v289_v9, %v297_v16 }
  0xe0   : > { %v299_v18 = vmul.f32 1.442695, %v298_v17 }
  0xe2   : > { %539 = vpow2.f32 %v299_v18 }
  0xec   : > { %v540_v19 = vpop.eup %539 }
  0xed   : > { %v301_v20 = vsel %vm290_vm1, %v540_v19, 0.0  ;;  %310 = vperm.xlu0 %537, %v540_v19  }
  0xee   : > { %v302_v21 = vrot.slane %v301_v20, 4 }
  0xf0   : > { %v303_v22 = vadd.f32 %v302_v21, %v301_v20 }
  0xf2   : > { %v304_v23 = vrot.slane %v303_v22, 2 }
  0xf4   : > { %v305_v24 = vadd.f32 %v304_v23, %v303_v22 }
  0xf6   : > { %v306_v25 = vrot.slane %v305_v24, 1 }
  0xf8   : > { %v307_v26 = vadd.f32 %v306_v25, %v305_v24 }
  0xfa   : > { %541 = vrcp.f32 %v307_v26 }
 0x104   : > { %v542_v27 = vpop.eup %541 }
 0x105   : > { %324 = vperm.xlu1 %538, %v542_v27  }
 0x16c   : > { %v311_v28 = vpop.permute.xlu0 %310 }
 0x16d   : > { %v313_v29 = vmul.f32 %v311_v28, %v801_v1 }
 0x16f   : > { %v314_v30 = vrot.slane %v313_v29, 4 }
 0x171   : > { %v315_v31 = vadd.f32 %v314_v30, %v313_v29 }
 0x173   : > { %v316_v32 = vrot.slane %v315_v31, 2 }
 0x175   : > { %v317_v33 = vadd.f32 %v316_v32, %v315_v31 }
 0x177   : > { %v318_v34 = vrot.slane %v317_v33, 1 }
 0x179   : > { %v319_v37 = vadd.f32 %v318_v34, %v317_v33 }
 0x184   : > { %v325_v38 = vpop.permute.xlu1 %324 }
 0x185   : > { %v327_v40 = vmul.f32 %v325_v38, %v319_v37 }
 0x187   : > { %v328_v43 = vmax.f32 %v327_v40, 0.0 }
 0x189   : > { %v337_v45 = vmul.f32 %v336_v41, %v328_v43  ;;  %v334_v46 = vmul.f32 %v331_v42, %v328_v43  ;;  %v364_v62 = vsub.f32 %v801_v1, %v328_v43 }
 0x18b   : > { %v339_v48 = vsel %vm338_vm2, %v337_v45, 0.0  ;;  %v335_v49 = vadd.f32 %v334_v46, %v333_v44 }
 0x18c   : > { %340 = vadd.xlane.f32.xlu1 %v339_v48 }
 0x18d   : > { %v348_v50 = vrot.slane %v335_v49, %v347_v47 }
 0x18f   : > { %v350_v51 = vmul.f32 %v348_v50, %v801_v1 }
 0x191   : > { %351 = vadd.xlane.f32.xlu1 %v350_v51 }
 0x219   : > { %v341_v53 = vpop.xlane.xlu1 %340 }
 0x21a   : > { %v343_v54 = vadd.f32 %v342_v52, %v341_v53 }
 0x21c   : > { %v356_v55 = vrot.slane %v343_v54, %v347_v47 }
 0x21e   : > { %v352_v56 = vpop.xlane.xlu1 %351 }
 0x21f   : > { %v357_v57 = vadd.f32 %v356_v55, %v352_v56 }
 0x221   : > { %v485_v58 = vmul.f32 -1.442695, %v357_v57 }
 0x223   : > { %543 = vpow2.f32 %v485_v58 }
 0x22d   : > { %v544_v59 = vpop.eup %543 }
 0x22e   : > { %v361_v60 = vadd.f32 1.0, %v544_v59 }
 0x230   : > { %545 = vrcp.f32 %v361_v60 }
 0x23a   : > { %v546_v61 = vpop.eup %545 }
 0x23b   : > { %367 = vperm.xlu1 %538, %v546_v61  }
 0x2ba   : > { %v368_v63 = vpop.permute.xlu1 %367 }
 0x2bb   : > { %v370_v0 = vmul.f32 %v368_v63, %v364_v62 }
 0x2bd   : > { %v371_v2 = vadd.f32 %v370_v0, %v328_v43 }
 0x2bf   : > { %372 = vst [vmem:[%s263_s15] sm:$0xff] %v371_v2 }
 0x2c0   : > { %590 = shalt.err (!%p587_p5)
}
 0x2c1   : > { %s591_s12 = scalar_lea.hbm %s828_s24, 128  ;;  %s595_s10 = scalar_lea.hbm %s877_s5, 256 }
 0x2c2   : > { %p592_p8 = scmp.ne.s32.totalorder %s828_s24, %s591_s12  ;;  %p596_p1 = scmp.lt.u32.totalorder %s828_s24, %s877_s5 }
 0x2c3   : > { %p597_p3 = scmp.lt.u32.totalorder %s595_s10, %s591_s12  ;;  %p599_p6 = scmp.lt.u32.totalorder %s591_s12, %s828_s24 }
 0x2c4   : > { %p593_p9 = pnand %p592_p8, %p886_p12 }
 0x2c5   : > { %p598_p11 = por %p597_p3, %p596_p1 }
 0x2c6   : > { %p594_p0 = pneg %p593_p9 }
 0x2c7   : > { %p600_p13 = por %p599_p6, %p598_p11 }
 0x2c9   : > { %p601_p7 = pnand %p600_p13, %p594_p0 }
 0x2cb   : > { %604 = shalt.err (!%p601_p7)
}
 0x2cc   : > { %492 = dma.vmem_to_hbm [thread:$0]  (%p886_p12), %s830_s17, 128, %s828_s24, %s374_s26  }
 0x2cd PF: > { %s399_s16 = sand.u32 1, %s631_s20   ;;  %p887_p10 = scmp.ne.s32.totalorder %s882_s7, 0 }
 0x2ce   : > { %p888_p2 = scmp.ge.s32.totalorder %s643_s23, 2  ;;  %s400_s13 = scalar_lea.sflag [#allocation5], %s399_s16 }
 0x2d0   : > { %p499_p4 = pnand %p888_p2, %p887_p10 }
 0x2d2   : > { %626 = dma.done.wait (!%p499_p4), %s400_s13, 128  }
 0x2d3   : > { %628 = vsyncadd (!%p499_p4), %s400_s13, 4294967168  ;;  %p20_p5 = scmp.ge.s32.totalorder %s706_s25, 4   ;;  %s889_s20 = smov %s635_s21 }
 0x2d4   : > { %s890_s21 = smov %s639_s22  ;;  %s891_s22 = smov %s718_s28 }
 0x2d5   : > { %s892_s23 = smov %s706_s25  ;;  %22 = sbr.rel (!%p20_p5) target bundleno = 8 (0x8), region = 91 }
 0x2dc   :  { %405 = vsyncpa [#allocation4], 1 }
 0x2dd   :  { %407 = vsyncpa [#allocation4 + $0x1], 1 }
 0x2de   :  { %408 = vsyncpa [#allocation5], 1 }
 0x2df   :  { %410 = vsyncpa [#allocation5 + $0x1], 1 }

</bundles_post_ra>
